<compile_context>
chip_gen: v5e
topology: v5e:2x2
jax: 0.10.0
libtpu: 0.0.40
codegen_flags: <defaults>
</compile_context>

<pallas_src>
import jax
import jax.numpy as jnp
from jax.experimental import pallas as pl
from jax.experimental.pallas import tpu as pltpu


def view_kernel(x_ref, o_ref, flag_ref):
    # The output HBM buffer aliases the input HBM buffer, and the view is a
    # pure reinterpretation of the same contiguous bytes, so there is nothing
    # to move.  A single one-word SMEM store keeps the kernel body non-empty
    # for the compiler; its cost is one scalar instruction.
    del x_ref, o_ref
    flag_ref[0] = jnp.int32(1)


def channel_view(x, n, h, w):
    """Pallas equivalent of torch.Tensor.view(n, -1, h, w) for contiguous x."""
    c_out = x.size // (n * h * w)
    # Free metadata reshape: collapses leading dims only, last two (tiled)
    # dims are unchanged, so no data movement is generated by XLA.
    x_collapsed = jnp.reshape(x, (n, c_out, h, w))
    return pl.pallas_call(
        view_kernel,
        out_shape=jax.ShapeDtypeStruct((n, c_out, h, w), x.dtype),
        # Leave both operands in place in HBM; no pipelining, no DMA.
        in_specs=[pl.BlockSpec(memory_space=pl.ANY)],
        out_specs=pl.BlockSpec(memory_space=pl.ANY),
        scratch_shapes=[pltpu.SMEM((1,), jnp.int32)],
        # Output is the very same buffer as the input: in-place no-op "copy".
        input_output_aliases={0: 0},
    )(x_collapsed)


if __name__ == "__main__":
    key = jax.random.PRNGKey(0)
    # Shapes implied by the module: x161 ~ randn([1, 116, 2, 14, 14]),
    # x154 = 1, x156 = x157 = 14.
    x161 = jax.random.normal(key, (1, 116, 2, 14, 14), dtype=jnp.float32)
    x154, x156, x157 = 1, 14, 14

    out = jax.block_until_ready(channel_view(x161, x154, x156, x157))

    # Reference semantics check (torch .view on a contiguous tensor == reshape).
    ref = jnp.reshape(x161, (x154, -1, x156, x157))
    assert out.shape == (1, 232, 14, 14), out.shape
    assert out.dtype == ref.dtype
    assert bool(jnp.array_equal(out, ref))

    print("KERNEL_OK")
</pallas_src>

<mosaic_0001>
module attributes {stable_mosaic.version = 11 : i64} {
  func.func @view_kernel(%arg0: memref<1x232x14x14xf32, #tpu.memory_space<any>>, %arg1: memref<1x232x14x14xf32, #tpu.memory_space<any>>, %arg2: memref<1xi32, #tpu.memory_space<smem>>) attributes {dimension_semantics = [], scalar_prefetch = 0 : i64, scratch_operands = 1 : i64, tpu.core_type = #tpu.core_type<tc>} {
    %c1_i32 = arith.constant 1 : i32
    %c0 = arith.constant 0 : index
    %0 = memref.load %arg2[%c0] : memref<1xi32, #tpu.memory_space<smem>>
    memref.store %c1_i32, %arg2[%c0] : memref<1xi32, #tpu.memory_space<smem>>
    return
  }
}

</mosaic_0001>

<bundles_post_ra>
// kernel: tpu_custom_call.1
= control target key start
LH: loop header
LB: loop body
LE: loop exit
PB: predicated region body
PF: predicated region fallthrough
CT: control target
= control target key end

     0   :  { %s18_s0 = inlined_call_operand.vmem [shape: f32[1,232,14,14], index: 0, kind: input, shape index: {}, may-alias: {0,1}]   ;;  %s19_s1 = inlined_call_operand.vmem [shape: f32[1,232,14,14], index: 1, kind: output, shape index: {}, may-alias: {0,1}]  }

</bundles_post_ra>
